<compile_context>
chip_gen: v7x
topology: tpu7x:2x2x1
jax: 0.10.0
libtpu: 0.0.40
codegen_flags: <defaults>
</compile_context>

<pallas_src>
import functools

import jax
import jax.numpy as jnp
from jax import lax
from jax.experimental import pallas as pl
from jax.experimental.pallas import tpu as pltpu


def _factorized_embedding_kernel(ids_ref, emb_hbm, w_ref, o_ref, gbuf, sem):
    # ids_ref : (T_pad,) int32 token ids in SMEM (scalar prefetch)
    # emb_hbm : (V, H) float32 embedding table, left in HBM (pl.ANY)
    # w_ref   : (tile_d, H) float32 slice of up.weight (PyTorch (D, H) layout)
    # o_ref   : (tile_t, tile_d) float32 output tile
    # gbuf    : (tile_t, H) float32 VMEM scratch holding gathered rows
    # sem     : DMA semaphore
    ti = pl.program_id(0)
    di = pl.program_id(1)
    tile_t = gbuf.shape[0]
    t_base = ti * tile_t

    # Gather this token tile's embedding rows from HBM once per token tile;
    # they are reused for every D tile (di > 0).
    @pl.when(di == 0)
    def _gather():
        @pl.loop(0, tile_t)
        def _start(t):
            tok = ids_ref[t_base + t]
            pltpu.make_async_copy(
                emb_hbm.at[pl.ds(tok, 1)], gbuf.at[pl.ds(t, 1)], sem
            ).start()

        @pl.loop(0, tile_t)
        def _wait(t):
            # All copies have identical size; wait once per issued copy.
            pltpu.make_async_copy(
                emb_hbm.at[pl.ds(0, 1)], gbuf.at[pl.ds(0, 1)], sem
            ).wait()

    # Factorized up-projection: (tile_t, H) x (tile_d, H) contracted over H.
    o_ref[...] = lax.dot_general(
        gbuf[...],
        w_ref[...],
        dimension_numbers=(((1,), (1,)), ((), ())),
        preferred_element_type=jnp.float32,
    ).astype(o_ref.dtype)


@functools.partial(jax.jit, static_argnames=("tile_t", "tile_d"))
def factorized_embedding(x, emb_table, up_weight, *, tile_t=128, tile_d=128):
    """x: (B, S) int32; emb_table: (V, H); up_weight: (D, H) (PyTorch Linear layout)."""
    B, S = x.shape
    V, H = emb_table.shape
    D = up_weight.shape[0]

    T = B * S
    nt = pl.cdiv(T, tile_t)
    T_pad = nt * tile_t
    nd = pl.cdiv(D, tile_d)
    D_pad = nd * tile_d

    # Flatten, clamp (avoid OOB DMA reads for bad ids), pad to a full tile.
    ids = jnp.clip(x.reshape(T).astype(jnp.int32), 0, V - 1)
    ids = jnp.pad(ids, (0, T_pad - T))

    # Pad the D axis of the weight so output tiles stay lane-dense (mult. of 128).
    w = up_weight
    if D_pad != D:
        w = jnp.pad(w, ((0, D_pad - D), (0, 0)))

    grid_spec = pltpu.PrefetchScalarGridSpec(
        num_scalar_prefetch=1,
        grid=(nt, nd),
        in_specs=[
            pl.BlockSpec(memory_space=pl.ANY),                        # emb table in HBM
            pl.BlockSpec((tile_d, H), lambda ti, di, ids: (di, 0)),   # up.weight tile
        ],
        out_specs=pl.BlockSpec((tile_t, tile_d), lambda ti, di, ids: (ti, di)),
        scratch_shapes=[
            pltpu.VMEM((tile_t, H), emb_table.dtype),   # gathered rows
            pltpu.SemaphoreType.DMA,                    # gather DMA semaphore
        ],
    )

    out_flat = pl.pallas_call(
        _factorized_embedding_kernel,
        out_shape=jax.ShapeDtypeStruct((T_pad, D_pad), jnp.float32),
        grid_spec=grid_spec,
        compiler_params=pltpu.CompilerParams(
            dimension_semantics=("parallel", "arbitrary")),
    )(ids, emb_table, w)

    return out_flat[:T, :D].reshape(B, S, D)


def init_params(key, num_embeddings, embedding_dim, hid_dim, padding_idx=1):
    k_emb, k_up = jax.random.split(key)
    # nn.Embedding default init: N(0, 1), padding_idx row zeroed.
    emb_table = jax.random.normal(k_emb, (num_embeddings, hid_dim), jnp.float32)
    emb_table = emb_table.at[padding_idx].set(0.0)
    # nn.Linear(hid_dim, embedding_dim, bias=False): weight (embedding_dim, hid_dim),
    # U(-1/sqrt(hid_dim), 1/sqrt(hid_dim)).
    bound = 1.0 / jnp.sqrt(jnp.float32(hid_dim))
    up_weight = jax.random.uniform(k_up, (embedding_dim, hid_dim), jnp.float32,
                                   minval=-bound, maxval=bound)
    return emb_table, up_weight


if __name__ == "__main__":
    key = jax.random.PRNGKey(0)
    k_params, k_ids = jax.random.split(key)

    # Small shapes consistent with the module (vocab V, factored H, final D).
    num_embeddings = 512   # V
    embedding_dim = 256    # D  (two 128-wide D tiles -> exercises the D grid axis)
    hid_dim = 64           # H
    padding_idx = 1
    B, S = 4, 64           # 256 tokens -> two 128-token tiles

    emb_table, up_weight = init_params(k_params, num_embeddings, embedding_dim,
                                       hid_dim, padding_idx)

    # Snap params to bf16-representable f32 values so the kernel-vs-XLA check is
    # independent of each path's internal MXU f32 emulation (products then exact).
    emb_table = emb_table.astype(jnp.bfloat16).astype(jnp.float32)
    up_weight = up_weight.astype(jnp.bfloat16).astype(jnp.float32)

    x = jax.random.randint(k_ids, (B, S), 0, num_embeddings, dtype=jnp.int32)
    # sprinkle in some padding tokens
    x = x.at[0, 0].set(padding_idx).at[1, 3].set(padding_idx)

    out = factorized_embedding(x, emb_table, up_weight, tile_t=128, tile_d=128)
    out = jax.block_until_ready(out)

    # Pure-JAX reference: embedding lookup then up-projection.
    ref = jnp.take(emb_table, x, axis=0) @ up_weight.T
    assert out.shape == (B, S, embedding_dim), out.shape
    err = float(jnp.max(jnp.abs(out - ref)))
    assert jnp.allclose(out, ref, atol=1e-4, rtol=1e-4), err

    print("KERNEL_OK")
</pallas_src>

<mosaic_0001>
module attributes {stable_mosaic.version = 11 : i64} {
  func.func @_factorized_embedding_kernel(%arg0: i32, %arg1: i32, %arg2: memref<256xi32, #tpu.memory_space<smem>>, %arg3: memref<512x64xf32, #tpu.memory_space<any>>, %arg4: memref<128x64xf32, #tpu.memory_space<vmem>>, %arg5: memref<128x128xf32, #tpu.memory_space<vmem>>, %arg6: memref<128x64xf32, #tpu.memory_space<vmem>>, %arg7: memref<!tpu.dma_semaphore, #tpu.memory_space<semaphore_mem>>) attributes {dimension_semantics = [#tpu.dimension_semantics<parallel>, #tpu.dimension_semantics<arbitrary>], iteration_bounds = array<i64: 2, 2>, scalar_prefetch = 1 : i64, scratch_operands = 2 : i64, tpu.core_type = #tpu.core_type<tc>, window_params = [{}, {transform_indices = @transform_1, window_bounds = array<i64: 128, 64>}, {transform_indices = @transform_2, window_bounds = array<i64: 128, 128>}]} {
    %c128_i32 = arith.constant 128 : i32
    %0 = arith.muli %arg0, %c128_i32 : i32
    %c0_i32 = arith.constant 0 : i32
    %1 = arith.cmpi eq, %arg1, %c0_i32 : i32
    %2 = arith.extui %1 : i1 to i32
    %c0_i32_0 = arith.constant 0 : i32
    %3 = arith.cmpi ne, %2, %c0_i32_0 : i32
    scf.if %3 {
      %c0_i32_6 = arith.constant 0 : i32
      %c128_i32_7 = arith.constant 128 : i32
      %8 = arith.addi %c0_i32_6, %c128_i32_7 : i32
      %c1_i32 = arith.constant 1 : i32
      scf.for %arg8 = %c0_i32_6 to %8 step %c1_i32  : i32 {
        %c1_i32_12 = arith.constant 1 : i32
        %10 = arith.muli %arg8, %c1_i32_12 : i32
        %c0_i32_13 = arith.constant 0 : i32
        %11 = arith.addi %c0_i32_13, %10 : i32
        %12 = arith.addi %0, %11 : i32
        %13 = arith.index_cast %12 : i32 to index
        %14 = memref.load %arg2[%13] : memref<256xi32, #tpu.memory_space<smem>>
        %c0_i32_14 = arith.constant 0 : i32
        %15 = tpu.memref_slice %arg3[%14, %c0_i32_14] : memref<512x64xf32, #tpu.memory_space<any>> -> memref<1x64xf32, #tpu.memory_space<any>>
        %c0_i32_15 = arith.constant 0 : i32
        %16 = tpu.memref_slice %arg6[%11, %c0_i32_15] : memref<128x64xf32, #tpu.memory_space<vmem>> -> memref<1x64xf32, #tpu.memory_space<vmem>>
        tpu.enqueue_dma source(%15 : memref<1x64xf32, #tpu.memory_space<any>>) target(%16 : memref<1x64xf32, #tpu.memory_space<vmem>>) target_semaphore(%arg7 : memref<!tpu.dma_semaphore, #tpu.memory_space<semaphore_mem>>)
      }
      %c128_i32_8 = arith.constant 128 : i32
      %c0_i32_9 = arith.constant 0 : i32
      %c128_i32_10 = arith.constant 128 : i32
      %9 = arith.addi %c0_i32_9, %c128_i32_10 : i32
      %c1_i32_11 = arith.constant 1 : i32
      scf.for %arg8 = %c0_i32_9 to %9 step %c1_i32_11  : i32 {
        %c0_i32_12 = arith.constant 0 : i32
        %c0_i32_13 = arith.constant 0 : i32
        %10 = tpu.memref_slice %arg3[%c0_i32_12, %c0_i32_13] : memref<512x64xf32, #tpu.memory_space<any>> -> memref<1x64xf32, #tpu.memory_space<any>>
        %c0_i32_14 = arith.constant 0 : i32
        %c0_i32_15 = arith.constant 0 : i32
        %11 = tpu.memref_slice %arg6[%c0_i32_14, %c0_i32_15] : memref<128x64xf32, #tpu.memory_space<vmem>> -> memref<1x64xf32, #tpu.memory_space<vmem>>
        tpu.wait_dma2 semaphore(%arg7 : memref<!tpu.dma_semaphore, #tpu.memory_space<semaphore_mem>>) src(%10 : memref<1x64xf32, #tpu.memory_space<any>>) dst(%11 : memref<1x64xf32, #tpu.memory_space<vmem>>)
      }
    } else {
    }
    %c0 = arith.constant 0 : index
    %c0_1 = arith.constant 0 : index
    %4 = vector.load %arg6[%c0, %c0_1] : memref<128x64xf32, #tpu.memory_space<vmem>>, vector<128x64xf32>
    %c0_2 = arith.constant 0 : index
    %c0_3 = arith.constant 0 : index
    %5 = vector.load %arg4[%c0_2, %c0_3] : memref<128x64xf32, #tpu.memory_space<vmem>>, vector<128x64xf32>
    %cst = arith.constant dense<0.000000e+00> : vector<128x128xf32>
    %6 = tpu.matmul %4, %5, %cst {dimension_numbers = #tpu.dot_dimension_numbers<[1], [1], [0], [0], [0, 0, 1, 0], [], []>} : vector<128x64xf32>, vector<128x64xf32>, vector<128x128xf32> -> vector<128x128xf32>
    %c0_4 = arith.constant 0 : index
    %c0_5 = arith.constant 0 : index
    %7 = vector.load %arg5[%c0_4, %c0_5] : memref<128x128xf32, #tpu.memory_space<vmem>>, vector<128x128xf32>
    tpu.vector_store %arg5[%c0_4, %c0_5], %6 {strides = array<i32>} : memref<128x128xf32, #tpu.memory_space<vmem>>, vector<128x128xf32>,
    return
  }
  func.func @transform_1(%arg0: i32, %arg1: i32, %arg2: memref<256xi32, #tpu.memory_space<smem>>) -> (i32, i32) {
    %c0_i32 = arith.constant 0 : i32
    %c0_i32_0 = arith.constant 0 : i32
    return %arg1, %c0_i32 : i32, i32
  }
  func.func @transform_2(%arg0: i32, %arg1: i32, %arg2: memref<256xi32, #tpu.memory_space<smem>>) -> (i32, i32) {
    %c0_i32 = arith.constant 0 : i32
    return %arg0, %arg1 : i32, i32
  }
}

</mosaic_0001>

<bundles_post_ra>
// kernel: factorized_embedding.1
= control target key start
LH: loop header
LB: loop body
LE: loop exit
PB: predicated region body
PF: predicated region fallthrough
CT: control target
= control target key end

     0   :  { %s1335_s0 = inlined_call_operand.vmem [shape: s32[256], index: 0, kind: input, shape index: {}]   ;;  %s1336_s1 = inlined_call_operand.vmem [shape: f32[512,64], index: 1, kind: input, shape index: {}]   ;;  %s1337_s2 = inlined_call_operand.vmem [shape: f32[256,64], index: 2, kind: input, shape index: {}]   ;;  %s1338_s3 = inlined_call_operand.hbm [shape: f32[256,256], index: 3, kind: output, shape index: {}]  }
   0x1   :  { %s8_s14 = sshll.u32 %s1335_s0, 4  ;;  %s9_s14 = int_to_ptr.vmem [resolvable:$true] %s8_s14 }
   0x2   :  { %s910_s15 = scalar_lea.vmem %s9_s14, 32  ;;  %p915_p1 = scmp.lt.s32.totalorder %s9_s14, %s9_s14 }
   0x3   :  { %p911_p0 = scmp.ne.s32.totalorder %s9_s14, %s910_s15  ;;  %p916_p2 = scmp.lt.s32.totalorder %s910_s15, %s910_s15 }
   0x5   :  { %p917_p3 = por %p916_p2, %p915_p1 }
   0x7   :  { %p918_p4 = pnand %p917_p3, %p911_p0 }
   0x9   :  { %921 = shalt.err (!%p918_p4)  }
   0xa   :  { %s1038_s16 = smov [#allocation5]  }
   0xb   :  { %11 = dma.vmem_to_smem %s9_s14, 32, %s1038_s16, [#allocation4] }
   0xc   :  { %990 = dma.done.wait [#allocation4], 32 }
   0xd   :  { %991 = vsyncadd [#allocation4], 4294967264 }
   0xe   :  { %13 = sfence }
   0xf   :  { %14 = vsyncpa [#allocation7], 0 }
  0x10   :  { %16 = vsyncpa [#allocation7 + $0x1], 0  ;;  %s1066_s17 = smov 0   ;;  %s1068_s18 = smov 0  }
  0x11   :  { %s1070_s0 = smov 0   ;;  %s1072_s19 = smov 0  }
  0x12   :  { %s1074_s20 = smov 0   ;;  %s1076_s21 = smov 0  }
  0x13   :  { %s1078_s22 = smov 0   ;;  %s1080_s23 = smov 0  }
  0x14 LB: > { %s617_s24 = sadd.s32 4294967295, %s1028_s23   ;;  %s618_s25 = sadd.s32 4294967294, %s1028_s23   ;;  %s1028_s23 = sphi %s1080_s23, %s22_s23   ;;  %s1024_s22 = sphi %s1078_s22, %s1349_s22   ;;  %s1020_s21 = sphi %s1076_s21, %s1348_s21   ;;  %s1016_s20 = sphi %s1074_s20, %s1347_s20   ;;  %s1012_s19 = sphi %s1072_s19, %s1346_s19   ;;  %s1008_s0 = sphi %s1070_s0, %s1345_s0   ;;  %s1004_s18 = sphi %s1068_s18, %s1344_s18   ;;  %s1000_s17 = sphi %s1066_s17, %s1343_s17  }
  0x15   : > { %s31_s26 = sadd.s32 1, %s1020_s21  ;;  %s34_s27 = sadd.s32 1, %s1024_s22 }
  0x16   : > { %p32_p5 = scmp.ge.s32.totalorder %s31_s26, 2  ;;  %p79_p6 = scmp.ne.s32.totalorder %s1008_s0, %s1004_s18 }
  0x17   : > { %p80_p7 = scmp.eq.s32.totalorder %s617_s24, 3  ;;  %p85_p10 = scmp.ne.s32.totalorder %s1004_s18, %s1000_s17 }
  0x18   : > { %s1351_s26 = smov (%p32_p5, %s31_s26), 0  ;;  %s1353_s27 = smov (!%p32_p5, %s34_s27), %s1024_s22 }
  0x19   : > { %s65_s28 = ssub.s32 %s1020_s21, %s1351_s26  ;;  %p1117_p8 = por %p80_p7, %p79_p6 }
  0x1a   : > { %p36_p9 = scmp.ge.s32.totalorder %s1353_s27, 2  ;;  %p86_p11 = scmp.eq.s32.totalorder %s618_s25, 3 }
  0x1b   : > { %p621_p12 = scmp.ge.s32.totalorder %s1028_s23, 1  ;;  %p113_p0 = scmp.lt.s32.totalorder %s1028_s23, 5 }
  0x1c   : > { %s1355_s27 = smov (%p36_p9, %s1353_s27), 0  ;;  %p1126_p13 = por %p86_p11, %p85_p10 }
  0x1d   : > { %s64_s4 = ssub.s32 %s1024_s22, %s1355_s27  ;;  %s69_s5 = sadd.s32 1, %s1008_s0 }
  0x1e   : > { %s66_s6 = sor.u32 %s65_s28, %s64_s4  ;;  %p114_p1 = pnand %p621_p12, %p113_p0 }
  0x1f   : > { %p67_p2 = scmp.eq.s32.totalorder %s66_s6, 0  ;;  %s130_s8 = sand.u32 (!%p114_p1), 1, %s1004_s18  }
  0x20   : > { %117 = sbr.rel (%p114_p1) target bundleno = 385 (0x181), region = 24  ;;  %s623_s9 = sshll.u32 (!%p114_p1), %s1012_s19, 4 }
  0x21   : > { %s1135_s7 = scalar_select %p67_p2, %s1008_s0, %s69_s5  }
  0x22   : > { %s622_s10 = sshll.u32 (!%p114_p1), %s130_s8, 7  ;;  %p134_p3 = scmp.lt.s32.totalorder (!%p114_p1), %s623_s9, 31 }
  0x23   : > { %s625_s11 = sshll.u32 (!%p114_p1), %s1016_s20, 7  ;;  %s1147_s16 = scalar_lea.vmem (!%p114_p1), [#allocation6], %s622_s10 }
  0x24   : > { %p626_p4 = scmp.ne.s32.totalorder (!%p114_p1), %s1012_s19, 0 }
  0x27   : > { %s1357_s9 = smov (!%p134_p3, %s623_s9), 31  ;;  %144 = sbr.rel (%p626_p4) target bundleno = 77 (0x4d), region = 28 }
  0x28   : > { %s624_s12 = sshll.u32 %s1357_s9, 3  ;;  %s1030_s24 = smov (!%p626_p4), 0  }
  0x29   : > { %s1145_s15 = scalar_lea.vmem %s1337_s2, %s624_s12 }
  0x2e LB: >> { %s151_s25 = sadd.s32 %s1032_s24, %s625_s11  ;;  %s154_s9 = scalar_lea.vmem [#allocation2], %s1032_s24  ;;  %s1032_s24 = sphi %s1030_s24, %s150_s24  }
  0x2f   : >> { %s152_s28 = sld [smem:[#allocation5 + %s151_s25]] }
  0x35   : >> { %s153_s6 = scalar_lea.vmem %s1336_s1, %s152_s28 }
  0x36   : >> { %v172_v0 = vld [vmem:[%s153_s6] sm:$0x1] }
  0x37   : >> { %173 = vst [vmem:[%s154_s9] sm:$0x1] %v172_v0 }
  0x38   : >> { %198 = vsyncadd [#allocation3], 16  ;;  %s150_s24 = sadd.s32 1, %s1032_s24  }
  0x39   : >> { %p147_p5 = scmp.ge.s32.totalorder %s150_s24, 128  }
  0x3a   : > { %s1034_s10 = smov (%p147_p5), 0  }
  0x3b   : > { %149 = sbr.rel (!%p147_p5) target bundleno = 46 (0x2e), region = 119 }
  0x42 LB: >> { %992 = dma.done.wait [#allocation3], 16  ;;  %s1036_s10 = sphi %s1034_s10, %s204_s10  }
  0x43   : >> { %993 = vsyncadd [#allocation3], 4294967280  ;;  %s204_s10 = sadd.s32 1, %s1036_s10  }
  0x44   : >> { %p201_p6 = scmp.ge.s32.totalorder %s204_s10, 128  }
  0x46   : > { %203 = sbr.rel (!%p201_p6) target bundleno = 66 (0x42), region = 130 }
  0x4d PF: > { %v224_v1 = vld [vmem:[%s1145_s15] sm:$0xff]  ;;  %v225_v2 = vld [vmem:[%s1145_s15 + $0x8] sm:$0xff]  ;;  %vm240_vm0 = vcmask 523264   ;;  %v226_v3 = vld [vmem:[%s1145_s15 + $0x10] sm:$0xff]  ;;  %s666_s11 = sshll.u32 %s1016_s20, 5  ;;  %s514_s20 = sshll.u32 %s1147_s16, 4  ;;  %s1275_s20 = int_to_ptr.vmem [resolvable:$true] %s514_s20 }
  0x4e   : > { %v755_v4 = vpack.c.bf16 %v225_v2, %v224_v1  ;;  %vm1158_vm1 = vmpackc.low %vm240_vm0, %vm240_vm0  ;;  %v227_v6 = vld [vmem:[%s1145_s15 + $0x18] sm:$0xff]  ;;  %v208_v8 = vld [vmem:[#allocation2] sm:$0xff]  ;;  %s511_s12 = sadd.s32 %s1012_s19, %s666_s11  ;;  %s1283_s24 = scalar_lea.sflag [#allocation7], %s130_s8 }
  0x4f   : > { %v761_v7 = vpack.c.bf16 %v227_v6, %v226_v3  ;;  %v228_v9 = vld [vmem:[%s1145_s15 + $0x20] sm:$0xff]  ;;  %v229_v10 = vld [vmem:[%s1145_s15 + $0x28] sm:$0xff]  ;;  %731 = vmatprep.mubr.msk.f32.mxu0 %vm240_vm0, %v208_v8  ;;  %v230_v13 = vld [vmem:[%s1145_s15 + $0x30] sm:$0xff]  ;;  %s662_s13 = sshll.u32 %s511_s12, 7  ;;  %s922_s25 = scalar_lea.vmem %s1275_s20, 2048 }
  0x50   : > { %757 = vmatprep.subr.msk.bf16.mxu0 %vm1158_vm1, %v755_v4  ;;  %803 = vmatprep.subr.msk.bf16.mxu1 %vm1158_vm1, %v755_v4  ;;  %v216_v11 = vld [vmem:[#allocation2 + $0x40] sm:$0xff]  ;;  %v767_v12 = vpack.c.bf16 %v229_v10, %v228_v9  ;;  %v231_v14 = vld [vmem:[%s1145_s15 + $0x38] sm:$0xff]  ;;  %v233_v17 = vld [vmem:[%s1145_s15 + $0x48] sm:$0xff]  ;;  %p923_p7 = scmp.ne.s32.totalorder %s1275_s20, %s922_s25  ;;  %s1039_s28 = smov [#allocation6]  }
  0x51   : > { %760 = vmatpush3.bf16.xpose.msk.msra.mxu0 %vm1158_vm1, %v755_v4  ;;  %811 = vmatpush3.bf16.xpose.msk.msra.mxu1 %vm1158_vm1, %v755_v4  ;;  %v773_v15 = vpack.c.bf16 %v231_v14, %v230_v13  ;;  %v232_v16 = vld [vmem:[%s1145_s15 + $0x40] sm:$0xff]  ;;  %v234_v19 = vld [vmem:[%s1145_s15 + $0x50] sm:$0xff]  ;;  %v235_v20 = vld [vmem:[%s1145_s15 + $0x58] sm:$0xff]  ;;  %s926_s4 = sshll.u32 %s1039_s28, 4  ;;  %s927_s4 = int_to_ptr.vmem [resolvable:$false] %s926_s4 }
  0x52   : > { %763 = vmatprep.subr.msk.bf16.mxu0 %vm1158_vm1, %v761_v7  ;;  %804 = vmatprep.subr.msk.bf16.mxu1 %vm1158_vm1, %v761_v7  ;;  %v779_v18 = vpack.c.bf16 %v233_v17, %v232_v16  ;;  %v785_v21 = vpack.c.bf16 %v235_v20, %v234_v19  ;;  %v236_v22 = vld [vmem:[%s1145_s15 + $0x60] sm:$0xff]  ;;  %v237_v23 = vld [vmem:[%s1145_s15 + $0x68] sm:$0xff]  ;;  %v238_v25 = vld [vmem:[%s1145_s15 + $0x70] sm:$0xff]  ;;  %p924_p9 = pnand %p923_p7, %p1117_p8  ;;  %s928_s5 = scalar_lea.vmem %s927_s4, 4096 }
  0x53   : > { %743 = vmatprep.mubr.msk.f32.mxu1 %vm240_vm0, %v216_v11  ;;  %v791_v24 = vpack.c.bf16 %v237_v23, %v236_v22  ;;  %v239_v26 = vld [vmem:[%s1145_s15 + $0x78] sm:$0xff]  ;;  %v209_v28 = vld [vmem:[#allocation2 + $0x8] sm:$0xff]  ;;  %v210_v30 = vld [vmem:[#allocation2 + $0x10] sm:$0xff]  ;;  %s1273_s15 = scalar_lea.hbm %s1338_s3, %s662_s13  ;;  %p929_p11 = scmp.lt.s32.totalorder %s1275_s20, %s927_s4 }
  0x54   : > { %v797_v27 = vpack.c.bf16 %v239_v26, %v238_v25  ;;  %v217_v29 = vld [vmem:[#allocation2 + $0x48] sm:$0xff]  ;;  %v218_v31 = vld [vmem:[#allocation2 + $0x50] sm:$0xff]  ;;  %v211_v32 = vld [vmem:[#allocation2 + $0x18] sm:$0xff]  ;;  %p925_p10 = pneg %p924_p9  ;;  %p930_p12 = scmp.lt.s32.totalorder %s928_s5, %s922_s25 }
  0x55   : > { %v219_v33 = vld [vmem:[#allocation2 + $0x58] sm:$0xff]  ;;  %v212_v34 = vld [vmem:[#allocation2 + $0x20] sm:$0xff]  ;;  %v213_v36 = vld [vmem:[#allocation2 + $0x28] sm:$0xff] }
  0x56   : > { %v220_v35 = vld [vmem:[#allocation2 + $0x60] sm:$0xff]  ;;  %v221_v37 = vld [vmem:[#allocation2 + $0x68] sm:$0xff]  ;;  %v214_v38 = vld [vmem:[#allocation2 + $0x30] sm:$0xff]  ;;  %p931_p0 = por %p930_p12, %p929_p11 }
  0x57   : > { %v222_v39 = vld [vmem:[#allocation2 + $0x70] sm:$0xff]  ;;  %v215_v40 = vld [vmem:[#allocation2 + $0x38] sm:$0xff] }
  0x58   : > { %v223_v41 = vld [vmem:[#allocation2 + $0x78] sm:$0xff]  ;;  %p932_p1 = pnand %p931_p0, %p925_p10 }
  0x59   : > { %766 = vmatpush3.bf16.xpose.msk.msra.mxu0 %vm1158_vm1, %v761_v7  ;;  %812 = vmatpush3.bf16.xpose.msk.msra.mxu1 %vm1158_vm1, %v761_v7 }
  0x5a   : > { %769 = vmatprep.subr.msk.bf16.mxu0 %vm1158_vm1, %v767_v12  ;;  %805 = vmatprep.subr.msk.bf16.mxu1 %vm1158_vm1, %v767_v12 }
  0x61   : > { %772 = vmatpush3.bf16.xpose.msk.msra.mxu0 %vm1158_vm1, %v767_v12  ;;  %813 = vmatpush3.bf16.xpose.msk.msra.mxu1 %vm1158_vm1, %v767_v12 }
  0x62   : > { %775 = vmatprep.subr.msk.bf16.mxu0 %vm1158_vm1, %v773_v15  ;;  %806 = vmatprep.subr.msk.bf16.mxu1 %vm1158_vm1, %v773_v15 }
  0x69   : > { %778 = vmatpush3.bf16.xpose.msk.msra.mxu0 %vm1158_vm1, %v773_v15  ;;  %814 = vmatpush3.bf16.xpose.msk.msra.mxu1 %vm1158_vm1, %v773_v15 }
  0x6a   : > { %781 = vmatprep.subr.msk.bf16.mxu0 %vm1158_vm1, %v779_v18  ;;  %807 = vmatprep.subr.msk.bf16.mxu1 %vm1158_vm1, %v779_v18 }
  0x71   : > { %784 = vmatpush3.bf16.xpose.msk.msra.mxu0 %vm1158_vm1, %v779_v18  ;;  %815 = vmatpush3.bf16.xpose.msk.msra.mxu1 %vm1158_vm1, %v779_v18 }
  0x72   : > { %787 = vmatprep.subr.msk.bf16.mxu0 %vm1158_vm1, %v785_v21  ;;  %808 = vmatprep.subr.msk.bf16.mxu1 %vm1158_vm1, %v785_v21 }
  0x79   : > { %790 = vmatpush3.bf16.xpose.msk.msra.mxu0 %vm1158_vm1, %v785_v21  ;;  %816 = vmatpush3.bf16.xpose.msk.msra.mxu1 %vm1158_vm1, %v785_v21 }
  0x7a   : > { %793 = vmatprep.subr.msk.bf16.mxu0 %vm1158_vm1, %v791_v24  ;;  %809 = vmatprep.subr.msk.bf16.mxu1 %vm1158_vm1, %v791_v24 }
  0x81   : > { %796 = vmatpush3.bf16.xpose.msk.msra.mxu0 %vm1158_vm1, %v791_v24  ;;  %817 = vmatpush3.bf16.xpose.msk.msra.mxu1 %vm1158_vm1, %v791_v24 }
  0x82   : > { %799 = vmatprep.subr.msk.bf16.mxu0 %vm1158_vm1, %v797_v27  ;;  %810 = vmatprep.subr.msk.bf16.mxu1 %vm1158_vm1, %v797_v27 }
  0x89   : > { %802 = vmatpush3.bf16.xpose.msk.msra.mxu0 %vm1158_vm1, %v797_v27  ;;  %818 = vmatpush3.bf16.xpose.msk.msra.mxu1 %vm1158_vm1, %v797_v27 }
  0x90   : > { %732 = vmatmul.mubr.msk.f32.vlgmr.msra.gmra.mrb[0].mxu0 %vm240_vm0, %v209_v28  ;;  %744 = vmatmul.mubr.msk.f32.vlgmr.msra.gmra.mrb[0].mxu1 %vm240_vm0, %v217_v29 }
  0x91   : > { %734 = vmatprep.mubr.msk.f32.mxu0 %vm240_vm0, %v210_v30  ;;  %746 = vmatprep.mubr.msk.f32.mxu1 %vm240_vm0, %v218_v31 }
  0x94   : > { %735 = vmatmul.mubr.msk.f32.gmra.mrb[2].mxu0 %vm240_vm0, %v211_v32  ;;  %747 = vmatmul.mubr.msk.f32.gmra.mrb[2].mxu1 %vm240_vm0, %v219_v33 }
  0x95   : > { %737 = vmatprep.mubr.msk.f32.mxu0 %vm240_vm0, %v212_v34  ;;  %749 = vmatprep.mubr.msk.f32.mxu1 %vm240_vm0, %v220_v35 }
  0x98   : > { %738 = vmatmul.mubr.msk.f32.gmra.mrb[4].mxu0 %vm240_vm0, %v213_v36  ;;  %750 = vmatmul.mubr.msk.f32.gmra.mrb[4].mxu1 %vm240_vm0, %v221_v37 }
  0x99   : > { %740 = vmatprep.mubr.msk.f32.mxu0 %vm240_vm0, %v214_v38  ;;  %752 = vmatprep.mubr.msk.f32.mxu1 %vm240_vm0, %v222_v39 }
  0x9c   : > { %741 = vmatmul.mubr.msk.f32.gmra.mrb[6].mxu0 %vm240_vm0, %v215_v40  ;;  %753 = vmatmul.mubr.msk.f32.gmra.mrb[6].mxu1 %vm240_vm0, %v223_v41 }
 0x163   : > { %v733_v42 = vpop.f32.mrb[0].mxu0  ;;  %v745_v43 = vpop.f32.mrb[0].mxu1 }
 0x164   : > { %483 = vst [vmem:[%s1147_s16 + $0x8] sm:$0xff] %v733_v42  ;;  %491 = vst [vmem:[%s1147_s16 + $0x48] sm:$0xff] %v745_v43  ;;  %v403_v44 = vpop.f32.mrb[1].mxu0  ;;  %v443_v45 = vpop.f32.mrb[1].mxu1 }
 0x165   : > { %482 = vst [vmem:[%s1147_s16] sm:$0xff] %v403_v44  ;;  %490 = vst [vmem:[%s1147_s16 + $0x40] sm:$0xff] %v443_v45 }
 0x167   : > { %v736_v46 = vpop.f32.mrb[2].mxu0  ;;  %v748_v47 = vpop.f32.mrb[2].mxu1 }
 0x168   : > { %485 = vst [vmem:[%s1147_s16 + $0x18] sm:$0xff] %v736_v46  ;;  %493 = vst [vmem:[%s1147_s16 + $0x58] sm:$0xff] %v748_v47  ;;  %v413_v48 = vpop.f32.mrb[3].mxu0  ;;  %v453_v49 = vpop.f32.mrb[3].mxu1 }
 0x169   : > { %484 = vst [vmem:[%s1147_s16 + $0x10] sm:$0xff] %v413_v48  ;;  %492 = vst [vmem:[%s1147_s16 + $0x50] sm:$0xff] %v453_v49 }
 0x16b   : > { %v739_v50 = vpop.f32.mrb[4].mxu0  ;;  %v751_v51 = vpop.f32.mrb[4].mxu1 }
 0x16c   : > { %487 = vst [vmem:[%s1147_s16 + $0x28] sm:$0xff] %v739_v50  ;;  %495 = vst [vmem:[%s1147_s16 + $0x68] sm:$0xff] %v751_v51  ;;  %v423_v52 = vpop.f32.mrb[5].mxu0  ;;  %v463_v53 = vpop.f32.mrb[5].mxu1 }
 0x16d   : > { %486 = vst [vmem:[%s1147_s16 + $0x20] sm:$0xff] %v423_v52  ;;  %494 = vst [vmem:[%s1147_s16 + $0x60] sm:$0xff] %v463_v53 }
 0x16f   : > { %v742_v54 = vpop.f32.mrb[6].mxu0  ;;  %v754_v55 = vpop.f32.mrb[6].mxu1 }
 0x170   : > { %489 = vst [vmem:[%s1147_s16 + $0x38] sm:$0xff] %v742_v54  ;;  %497 = vst [vmem:[%s1147_s16 + $0x78] sm:$0xff] %v754_v55  ;;  %v433_v56 = vpop.f32.mrb[7].mxu0  ;;  %v473_v57 = vpop.f32.mrb[7].mxu1 }
 0x171   : > { %488 = vst [vmem:[%s1147_s16 + $0x30] sm:$0xff] %v433_v56  ;;  %496 = vst [vmem:[%s1147_s16 + $0x70] sm:$0xff] %v473_v57 }
 0x172   : > { %935 = shalt.err (!%p932_p1)
}
 0x173   : > { %s936_s8 = scalar_lea.hbm %s1273_s15, 2048  ;;  %s940_s9 = scalar_lea.hbm %s1338_s3, 8192 }
 0x174   : > { %p937_p2 = scmp.ne.s32.totalorder %s1273_s15, %s936_s8  ;;  %p941_p5 = scmp.lt.u32.totalorder %s1273_s15, %s1338_s3 }
 0x175   : > { %p942_p6 = scmp.lt.u32.totalorder %s940_s9, %s936_s8  ;;  %p944_p9 = scmp.lt.u32.totalorder %s936_s8, %s1273_s15 }
 0x176   : > { %p938_p3 = pnand %p937_p2, %p1117_p8 }
 0x177   : > { %p943_p7 = por %p942_p6, %p941_p5 }
 0x178   : > { %p939_p4 = pneg %p938_p3 }
 0x179   : > { %p945_p10 = por %p944_p9, %p943_p7 }
 0x17b   : > { %p946_p11 = pnand %p945_p10, %p939_p4 }
 0x17d   : > { %949 = shalt.err (!%p946_p11)
}
 0x17e   : > { %s1040_s12 = smov 128   ;;  %s1041_s13 = smov 256  }
 0x17f   : > { %s1042_s19 = smov 8  }
 0x180   : > { %819 = dma.vmem_to_hbm [thread:$0]  (%p1117_p8), %s1275_s20, 2048, %s1273_s15, %s1283_s24, %s1040_s12, %s1041_s13, %s1042_s19  }
 0x181 PF: > { %p825_p12 = scmp.ge.s32.totalorder %s1028_s23, 2  ;;  %s529_s14 = sand.u32 1, %s1000_s17  }
 0x182   : > { %s530_s25 = scalar_lea.sflag [#allocation7], %s529_s14 }
 0x183   : > { %p822_p0 = pnand %p825_p12, %p1126_p13 }
 0x185   : > { %995 = dma.done.wait (!%p822_p0), %s530_s25, 2048  }
 0x186   : > { %997 = vsyncadd (!%p822_p0), %s530_s25, 4294965248  ;;  %s22_s23 = sadd.s32 1, %s1028_s23   ;;  %s1343_s17 = smov %s1004_s18 }
 0x187   : > { %p19_p1 = scmp.ge.s32.totalorder %s22_s23, 6   ;;  %s1344_s18 = smov %s1008_s0 }
 0x188   : > { %s1345_s0 = smov %s1135_s7  ;;  %s1346_s19 = smov %s1020_s21 }
 0x189   : > { %s1347_s20 = smov %s1024_s22  ;;  %s1348_s21 = smov %s1351_s26 }
 0x18a   : > { %s1349_s22 = smov %s1355_s27  ;;  %21 = sbr.rel (!%p19_p1) target bundleno = 20 (0x14), region = 141 }
 0x191   :  { %535 = vsyncpa [#allocation7], 1 }
 0x192   :  { %537 = vsyncpa [#allocation7 + $0x1], 1 }
 0x193   :  { %538 = vsyncmov [#allocation3] }
 0x196   :  { %s539_s29 = vpop.sfrf %538 }
 0x197   :  { %p665_p8 = scmp.ne.s32.totalorder %s539_s29, 0 }
 0x199   :  { %543 = shalt.err (%p665_p8)  }

</bundles_post_ra>
